<compile_context>
chip_gen: v5e
topology: v5e:2x2
jax: 0.10.0
libtpu: 0.0.40
codegen_flags: <defaults>
</compile_context>

<pallas_src>
import math

import jax
import jax.numpy as jnp
from jax.experimental import pallas as pl
from jax.experimental.pallas import tpu as pltpu


# ----------------------------------------------------------------------------------
# Kernel: fused fc1 -> ReLU -> fc2 for one batch tile, feature-major layout.
#   xT_ref  : (D, TB)   input tile, batch on lanes
#   w1_ref  : (H, D)    fc1 weight (PyTorch layout: out x in)
#   b1_ref  : (H, 1)    fc1 bias as a column
#   w2_ref  : (O, H)    fc2 weight
#   b2_ref  : (O, 1)    fc2 bias as a column
#   outT_ref: (O, TB)   output tile (transposed), lane-dense store
# ----------------------------------------------------------------------------------
def mlp_kernel(xT_ref, w1_ref, b1_ref, w2_ref, b2_ref, outT_ref):
    xT = xT_ref[...]                                                      # (D, TB)

    # fc1 + ReLU (dropout: eval mode == identity)
    h = jnp.dot(w1_ref[...], xT, preferred_element_type=jnp.float32)      # (H, TB)
    h = jnp.maximum(h + b1_ref[...], 0.0)

    # fc2
    outT = jnp.dot(w2_ref[...], h, preferred_element_type=jnp.float32)    # (O, TB)
    outT_ref[...] = (outT + b2_ref[...]).astype(outT_ref.dtype)


# ----------------------------------------------------------------------------------
# Wrapper: accepts the PyTorch (batch, features) convention and PyTorch weight layout.
# ----------------------------------------------------------------------------------
def mlp_forward(x, w1, b1, w2, b2, *, tile_b=128):
    B, D = x.shape
    H = w1.shape[0]
    O = w2.shape[0]
    assert w1.shape == (H, D) and b1.shape == (H,)
    assert w2.shape == (O, H) and b2.shape == (O,)
    assert B % tile_b == 0 and tile_b % 128 == 0, "batch tile must be a multiple of 128"

    # Layout plumbing (outside the kernel): batch goes on the lane (last) axis.
    xT = jnp.transpose(x)                 # (D, B)
    b1c = b1.reshape(H, 1)                # column biases broadcast over lanes
    b2c = b2.reshape(O, 1)

    grid = (B // tile_b,)

    outT = pl.pallas_call(
        mlp_kernel,
        out_shape=jax.ShapeDtypeStruct((O, B), jnp.float32),
        grid_spec=pltpu.PrefetchScalarGridSpec(
            num_scalar_prefetch=0,
            grid=grid,
            in_specs=[
                pl.BlockSpec((D, tile_b), lambda i: (0, i)),   # x^T : batch tile on lanes
                pl.BlockSpec((H, D), lambda i: (0, 0)),        # W1  (grid-invariant)
                pl.BlockSpec((H, 1), lambda i: (0, 0)),        # b1
                pl.BlockSpec((O, H), lambda i: (0, 0)),        # W2
                pl.BlockSpec((O, 1), lambda i: (0, 0)),        # b2
            ],
            out_specs=pl.BlockSpec((O, tile_b), lambda i: (0, i)),  # lane-dense output store
        ),
        compiler_params=pltpu.CompilerParams(
            dimension_semantics=("parallel",),   # shard batch tiles across TCs on v7x
            vmem_limit_bytes=64 << 20,           # explicit budget; trivially fits even on v7x
        ),
    )(xT, w1, b1c, w2, b2c)

    return jnp.transpose(outT)            # back to (B, O)


# ----------------------------------------------------------------------------------
# Pure-JAX reference (mirrors the PyTorch forward, eval mode)
# ----------------------------------------------------------------------------------
def reference(x, w1, b1, w2, b2):
    h = jnp.maximum(
        jnp.dot(x, w1.T, precision=jax.lax.Precision.HIGHEST) + b1, 0.0)
    return jnp.dot(h, w2.T, precision=jax.lax.Precision.HIGHEST) + b2


# ----------------------------------------------------------------------------------
if __name__ == "__main__":
    # Small shapes consistent with the module: batch=256, input_dim=64,
    # hidden_dim=128, output_dim=32.  tile_b=128 -> grid of 2 batch tiles.
    B, D, H, O = 256, 64, 128, 32

    key = jax.random.PRNGKey(0)
    kx, k1, k2, k3, k4 = jax.random.split(key, 5)
    x = jax.random.normal(kx, (B, D), jnp.float32)
    w1 = jax.random.normal(k1, (H, D), jnp.float32) * (1.0 / math.sqrt(D))
    b1 = 0.1 * jax.random.normal(k2, (H,), jnp.float32)
    w2 = jax.random.normal(k3, (O, H), jnp.float32) * (1.0 / math.sqrt(H))
    b2 = 0.1 * jax.random.normal(k4, (O,), jnp.float32)

    out = mlp_forward(x, w1, b1, w2, b2, tile_b=128)
    out = jax.block_until_ready(out)

    ref = reference(x, w1, b1, w2, b2)
    assert out.shape == (B, O)
    assert jnp.allclose(out, ref, rtol=1e-4, atol=1e-4), "mismatch vs reference"

    print("KERNEL_OK")
</pallas_src>

<mosaic_0001>
module attributes {stable_mosaic.version = 11 : i64} {
  func.func @mlp_kernel(%arg0: i32, %arg1: memref<64x128xf32, #tpu.memory_space<vmem>>, %arg2: memref<128x64xf32, #tpu.memory_space<vmem>>, %arg3: memref<128x1xf32, #tpu.memory_space<vmem>>, %arg4: memref<32x128xf32, #tpu.memory_space<vmem>>, %arg5: memref<32x1xf32, #tpu.memory_space<vmem>>, %arg6: memref<32x128xf32, #tpu.memory_space<vmem>>) attributes {dimension_semantics = [#tpu.dimension_semantics<parallel>], iteration_bounds = array<i64: 2>, scalar_prefetch = 0 : i64, scratch_operands = 0 : i64, tpu.core_type = #tpu.core_type<tc>, window_params = [{transform_indices = @transform_0, window_bounds = array<i64: 64, 128>}, {pipeline_mode = #tpu.pipeline_mode<synchronous>, transform_indices = @transform_1, window_bounds = array<i64: 128, 64>}, {pipeline_mode = #tpu.pipeline_mode<synchronous>, transform_indices = @transform_2, window_bounds = array<i64: 128, 1>}, {pipeline_mode = #tpu.pipeline_mode<synchronous>, transform_indices = @transform_3, window_bounds = array<i64: 32, 128>}, {pipeline_mode = #tpu.pipeline_mode<synchronous>, transform_indices = @transform_4, window_bounds = array<i64: 32, 1>}, {transform_indices = @transform_5, window_bounds = array<i64: 32, 128>}]} {
    %c0 = arith.constant 0 : index
    %c0_0 = arith.constant 0 : index
    %0 = vector.load %arg1[%c0, %c0_0] : memref<64x128xf32, #tpu.memory_space<vmem>>, vector<64x128xf32>
    %c0_1 = arith.constant 0 : index
    %c0_2 = arith.constant 0 : index
    %1 = vector.load %arg2[%c0_1, %c0_2] : memref<128x64xf32, #tpu.memory_space<vmem>>, vector<128x64xf32>
    %cst = arith.constant dense<0.000000e+00> : vector<128x128xf32>
    %2 = tpu.matmul %1, %0, %cst {dimension_numbers = #tpu.dot_dimension_numbers<[1], [0], [0], [1], [0, 0, 1, 1], [], []>} : vector<128x64xf32>, vector<64x128xf32>, vector<128x128xf32> -> vector<128x128xf32>
    %c0_3 = arith.constant 0 : index
    %c0_4 = arith.constant 0 : index
    %3 = vector.load %arg3[%c0_3, %c0_4] : memref<128x1xf32, #tpu.memory_space<vmem>>, vector<128x1xf32>
    %4 = vector.broadcast %3 : vector<128x1xf32> to vector<128x128xf32>
    %5 = arith.addf %2, %4 : vector<128x128xf32>
    %cst_5 = arith.constant 0.000000e+00 : f32
    %6 = vector.broadcast %cst_5 : f32 to vector<128x128xf32>
    %7 = arith.maximumf %5, %6 : vector<128x128xf32>
    %c0_6 = arith.constant 0 : index
    %c0_7 = arith.constant 0 : index
    %8 = vector.load %arg4[%c0_6, %c0_7] : memref<32x128xf32, #tpu.memory_space<vmem>>, vector<32x128xf32>
    %cst_8 = arith.constant dense<0.000000e+00> : vector<32x128xf32>
    %9 = tpu.matmul %8, %7, %cst_8 {dimension_numbers = #tpu.dot_dimension_numbers<[1], [0], [0], [1], [0, 0, 1, 1], [], []>} : vector<32x128xf32>, vector<128x128xf32>, vector<32x128xf32> -> vector<32x128xf32>
    %c0_9 = arith.constant 0 : index
    %c0_10 = arith.constant 0 : index
    %10 = vector.load %arg5[%c0_9, %c0_10] : memref<32x1xf32, #tpu.memory_space<vmem>>, vector<32x1xf32>
    %11 = vector.broadcast %10 : vector<32x1xf32> to vector<32x128xf32>
    %12 = arith.addf %9, %11 : vector<32x128xf32>
    %c0_11 = arith.constant 0 : index
    %c0_12 = arith.constant 0 : index
    %13 = vector.load %arg6[%c0_11, %c0_12] : memref<32x128xf32, #tpu.memory_space<vmem>>, vector<32x128xf32>
    tpu.vector_store %arg6[%c0_11, %c0_12], %12 {strides = array<i32>} : memref<32x128xf32, #tpu.memory_space<vmem>>, vector<32x128xf32>,
    return
  }
  func.func @transform_0(%arg0: i32) -> (i32, i32) {
    %c0_i32 = arith.constant 0 : i32
    %c0_i32_0 = arith.constant 0 : i32
    return %c0_i32, %arg0 : i32, i32
  }
  func.func @transform_1(%arg0: i32) -> (i32, i32) {
    %c0_i32 = arith.constant 0 : i32
    %c0_i32_0 = arith.constant 0 : i32
    %c0_i32_1 = arith.constant 0 : i32
    return %c0_i32, %c0_i32_0 : i32, i32
  }
  func.func @transform_2(%arg0: i32) -> (i32, i32) {
    %c0_i32 = arith.constant 0 : i32
    %c0_i32_0 = arith.constant 0 : i32
    %c0_i32_1 = arith.constant 0 : i32
    return %c0_i32, %c0_i32_0 : i32, i32
  }
  func.func @transform_3(%arg0: i32) -> (i32, i32) {
    %c0_i32 = arith.constant 0 : i32
    %c0_i32_0 = arith.constant 0 : i32
    %c0_i32_1 = arith.constant 0 : i32
    return %c0_i32, %c0_i32_0 : i32, i32
  }
  func.func @transform_4(%arg0: i32) -> (i32, i32) {
    %c0_i32 = arith.constant 0 : i32
    %c0_i32_0 = arith.constant 0 : i32
    %c0_i32_1 = arith.constant 0 : i32
    return %c0_i32, %c0_i32_0 : i32, i32
  }
  func.func @transform_5(%arg0: i32) -> (i32, i32) {
    %c0_i32 = arith.constant 0 : i32
    %c0_i32_0 = arith.constant 0 : i32
    return %c0_i32, %arg0 : i32, i32
  }
}

</mosaic_0001>

<bundles_post_ra>
// kernel: tpu_custom_call.1
= control target key start
LH: loop header
LB: loop body
LE: loop exit
PB: predicated region body
PF: predicated region fallthrough
CT: control target
= control target key end

     0   :  { %10 = vsyncpa [#allocation4], 0  ;;  %s1112_s0 = inlined_call_operand.vmem [shape: f32[64,256], index: 0, kind: input, shape index: {}]   ;;  %s1113_s1 = inlined_call_operand.vmem [shape: f32[128,64], index: 1, kind: input, shape index: {}]   ;;  %s1114_s2 = inlined_call_operand.vmem [shape: f32[128,1], index: 2, kind: input, shape index: {}]   ;;  %s1115_s3 = inlined_call_operand.vmem [shape: f32[32,128], index: 3, kind: input, shape index: {}]   ;;  %s1116_s4 = inlined_call_operand.vmem [shape: f32[32,1], index: 4, kind: input, shape index: {}]   ;;  %s1117_s5 = inlined_call_operand.hbm [shape: f32[32,256], index: 5, kind: output, shape index: {}]  }
   0x1   :  { %12 = vsyncpa [#allocation4 + $0x1], 0  ;;  %s868_s18 = smov 0   ;;  %s870_s19 = smov 0  }
   0x2   :  { %s872_s20 = smov 0   ;;  %s874_s21 = smov 0  }
   0x3 LB: > { %s679_s22 = sadd.s32 4294967295, %s832_s21   ;;  %s680_s23 = sadd.s32 4294967294, %s832_s21   ;;  %s832_s21 = sphi %s874_s21, %s1123_s21   ;;  %s828_s20 = sphi %s872_s20, %s1122_s20   ;;  %s824_s19 = sphi %s870_s19, %s1121_s19   ;;  %s820_s18 = sphi %s868_s18, %s1120_s18  }
   0x4   : > { %s891_s24 = sadd.s32 1, %s832_s21   ;;  %s25_s25 = sadd.s32 1, %s828_s20 }
   0x5   : > { %s22_s26 = ssub.s32 %s832_s21, %s891_s24  ;;  %p32_p0 = scmp.ne.s32.totalorder %s828_s20, %s824_s19 }
   0x6   : > { %p23_p1 = scmp.eq.s32.totalorder %s22_s26, 0  ;;  %p33_p2 = scmp.eq.s32.totalorder %s832_s21, 0 }
   0x7   : > { %p146_p3 = scmp.eq.s32.totalorder %s679_s22, 1  ;;  %p151_p4 = scmp.ne.s32.totalorder %s824_s19, %s820_s18 }
   0x8   : > { %s904_s27 = scalar_select %p23_p1, %s828_s20, %s25_s25  }
   0x9   : > { %p34_p5 = por %p33_p2, %p32_p0  ;;  %p906_p6 = por %p146_p3, %p32_p0 }
   0xa   : > { %p152_p7 = scmp.eq.s32.totalorder %s680_s23, 1  ;;  %p682_p9 = scmp.ge.s32.totalorder %s832_s21, 2 }
   0xc   : > { %p910_p8 = por %p152_p7, %p151_p4  ;;  %180 = sbr.rel (%p682_p9) target bundleno = 29 (0x1d), region = 32 }
  0x11   : > { %183 = sbr.rel (!%p34_p5) target bundleno = 29 (0x1d), region = 36  ;;  %s185_s30 = sand.u32 (%p34_p5), 1, %s828_s20  }
  0x12   : > { %s684_s6 = sshll.u32 (%p34_p5), %s832_s21, 3  ;;  %s683_s7 = sshll.u32 (%p34_p5), %s185_s30, 6 }
  0x13   : > { %s189_s10 = scalar_lea.vmem (%p34_p5), %s1112_s0, %s684_s6  ;;  %s187_s11 = scalar_lea.vmem (%p34_p5), [#allocation2], %s683_s7 }
  0x14   : > { %v232_v0 = vld [vmem:[%s189_s10] sm:$0xff] (%p34_p5)  ;;  %v234_v1 = vld [vmem:[%s189_s10 + $0x10] sm:$0xff] (%p34_p5) }
  0x15   : > { %v236_v2 = vld [vmem:[%s189_s10 + $0x20] sm:$0xff] (%p34_p5)  ;;  %233 = vst [vmem:[%s187_s11] sm:$0xff] (%p34_p5), %v232_v0  ;;  %v238_v3 = vld [vmem:[%s189_s10 + $0x30] sm:$0xff] (%p34_p5) }
  0x16   : > { %235 = vst [vmem:[%s187_s11 + $0x8] sm:$0xff] %v234_v1  ;;  %v240_v4 = vld [vmem:[%s189_s10 + $0x40] sm:$0xff]  ;;  %v242_v5 = vld [vmem:[%s189_s10 + $0x50] sm:$0xff] }
  0x17   : > { %237 = vst [vmem:[%s187_s11 + $0x10] sm:$0xff] %v236_v2  ;;  %v244_v6 = vld [vmem:[%s189_s10 + $0x60] sm:$0xff]  ;;  %v246_v7 = vld [vmem:[%s189_s10 + $0x70] sm:$0xff] }
  0x18   : > { %239 = vst [vmem:[%s187_s11 + $0x18] sm:$0xff] %v238_v3 }
  0x19   : > { %241 = vst [vmem:[%s187_s11 + $0x20] sm:$0xff] %v240_v4 }
  0x1a   : > { %243 = vst [vmem:[%s187_s11 + $0x28] sm:$0xff] %v242_v5 }
  0x1b   : > { %245 = vst [vmem:[%s187_s11 + $0x30] sm:$0xff] %v244_v6 }
  0x1c   : > { %247 = vst [vmem:[%s187_s11 + $0x38] sm:$0xff] %v246_v7 }
  0x1d PF: > { %p685_p10 = scmp.ge.s32.totalorder %s832_s21, 1  ;;  %p252_p11 = scmp.lt.s32.totalorder %s832_s21, 3 }
  0x1f   : > { %p253_p12 = pnand %p685_p10, %p252_p11 }
  0x20   : > { %s925_s12 = sand.u32 (!%p253_p12), 1, %s824_s19   ;;  %s705_s6 = sshll.u32 (!%p253_p12), %s679_s22, 3 }
  0x21   : > { %256 = sbr.rel (%p253_p12) target bundleno = 413 (0x19d), region = 74  ;;  %s686_s17 = sshll.u32 (!%p253_p12), %s925_s12, 6 }
  0x22   : > { %s934_s23 = scalar_lea.vmem (!%p253_p12), [#allocation2], %s686_s17  ;;  %s687_s26 = sshll.u32 (!%p253_p12), %s925_s12, 5 }
  0x23   : > { %s285_s30 = scalar_lea.vmem (!%p253_p12), [#allocation3], %s687_s26  ;;  %s608_s9 = scalar_lea.hbm (!%p253_p12), %s1117_s5, %s705_s6 }
  0x24   : > { %s609_s10 = sshll.u32 (!%p253_p12), %s285_s30, 4  ;;  %s611_s11 = sshll.u32 (!%p253_p12), %s608_s9, 4  ;;  %s610_s10 = int_to_ptr.vmem [resolvable:$true] %s609_s10  ;;  %s612_s11 = int_to_ptr.hbm [resolvable:$true] %s611_s11 }
  0x25   : > { %s598_s13 = scalar_lea.sflag (!%p253_p12), [#allocation4], %s925_s12  ;;  %s784_s14 = sshra.s32 (!%p253_p12), %s612_s11, 4  ;;  %s785_s14 = int_to_ptr.hbm [resolvable:$true] %s784_s14 }
  0x26   : > { %v325_v8 = vld [vmem:[%s1114_s2 + $0x78] sm:$0xff]  ;;  %v323_v9 = vld [vmem:[%s1114_s2 + $0x68] sm:$0xff]  ;;  %v834_v10 = vmov 0   ;;  %v292_v12 = vld [vmem:[%s934_s23 + $0x30] sm:$0xff]  ;;  %vm406_vm0 = vcmask 523264   ;;  %s786_s22 = scalar_lea.hbm %s785_s14, 32  ;;  %p791_p2 = scmp.lt.s32.totalorder %s785_s14, %s1117_s5 }
  0x27   : > { %767 = vset.pattern.permute.xlu0 %v834_v10  ;;  %768 = vset.pattern.permute.xlu1 %v834_v10  ;;  %v293_v11 = vld [vmem:[%s934_s23 + $0x38] sm:$0xff]  ;;  %v291_v13 = vld [vmem:[%s934_s23 + $0x28] sm:$0xff]  ;;  %v290_v14 = vld [vmem:[%s934_s23 + $0x20] sm:$0xff]  ;;  %p787_p13 = scmp.ne.s32.totalorder %s785_s14, %s786_s22  ;;  %s790_s17 = scalar_lea.hbm %s1117_s5, 64 }
  0x28   : > { %403 = vperm.xlu0 %767, %v325_v8   ;;  %393 = vperm.xlu1 %768, %v323_v9   ;;  %v324_v15 = vld [vmem:[%s1114_s2 + $0x70] sm:$0xff]  ;;  %v289_v16 = vld [vmem:[%s934_s23 + $0x18] sm:$0xff]  ;;  %v322_v17 = vld [vmem:[%s1114_s2 + $0x60] sm:$0xff]  ;;  %p792_p3 = scmp.lt.s32.totalorder %s790_s17, %s786_s22 }
  0x29   : > { %769 = vset.pattern.permute.xlu2 %v834_v10  ;;  %708 = vmatpush.msra.mxu2 %v293_v11  ;;  %v288_v18 = vld [vmem:[%s934_s23 + $0x10] sm:$0xff]  ;;  %v287_v19 = vld [vmem:[%s934_s23 + $0x8] sm:$0xff]  ;;  %v321_v20 = vld [vmem:[%s1114_s2 + $0x58] sm:$0xff]  ;;  %p788_p0 = pnand %p787_p13, %p906_p6 }
  0x2a   : > { %709 = vmatpush.msra.mxu3 %v293_v11  ;;  %463 = vmatpush.msra.mxu0 %v293_v11  ;;  %v286_v21 = vld [vmem:[%s934_s23] sm:$0xff]  ;;  %v299_v22 = vld [vmem:[%s1113_s1 + $0x28] sm:$0xff]  ;;  %v305_v23 = vld [vmem:[%s1113_s1 + $0x58] sm:$0xff]  ;;  %p793_p4 = por %p792_p3, %p791_p2 }
  0x2b   : > { %710 = vmatpush.msra.mxu2 %v292_v12  ;;  %383 = vperm.xlu2 %769, %v321_v20   ;;  %v319_v24 = vld [vmem:[%s1114_s2 + $0x48] sm:$0xff]  ;;  %v294_v25 = vld [vmem:[%s1113_s1] sm:$0xff]  ;;  %v320_v27 = vld [vmem:[%s1114_s2 + $0x50] sm:$0xff]  ;;  %p789_p1 = pneg %p788_p0 }
  0x2c   : > { %711 = vmatpush.msra.mxu3 %v292_v12  ;;  %464 = vmatpush.msra.mxu0 %v292_v12  ;;  %v318_v26 = vld [vmem:[%s1114_s2 + $0x40] sm:$0xff]  ;;  %v300_v28 = vld [vmem:[%s1113_s1 + $0x30] sm:$0xff]  ;;  %v295_v31 = vld [vmem:[%s1113_s1 + $0x8] sm:$0xff] }
  0x2d   : > { %712 = vmatpush.msra.mxu2 %v291_v13  ;;  %v306_v29 = vld [vmem:[%s1113_s1 + $0x60] sm:$0xff]  ;;  %v316_v30 = vld [vmem:[%s1114_s2 + $0x30] sm:$0xff]  ;;  %v315_v32 = vld [vmem:[%s1114_s2 + $0x28] sm:$0xff]  ;;  %p794_p5 = pnand %p793_p4, %p789_p1 }
  0x2e   : > { %713 = vmatpush.msra.mxu3 %v291_v13  ;;  %465 = vmatpush.msra.mxu0 %v291_v13  ;;  %v317_v33 = vld [vmem:[%s1114_s2 + $0x38] sm:$0xff]  ;;  %v307_v35 = vld [vmem:[%s1113_s1 + $0x68] sm:$0xff]  ;;  %v296_v37 = vld [vmem:[%s1113_s1 + $0x10] sm:$0xff] }
  0x2f   : > { %714 = vmatpush.msra.mxu2 %v290_v14  ;;  %v301_v34 = vld [vmem:[%s1113_s1 + $0x38] sm:$0xff]  ;;  %v312_v38 = vld [vmem:[%s1114_s2 + $0x10] sm:$0xff]  ;;  %v314_v39 = vld [vmem:[%s1114_s2 + $0x20] sm:$0xff] }
  0x30   : > { %715 = vmatpush.msra.mxu3 %v290_v14  ;;  %466 = vmatpush.msra.mxu0 %v290_v14  ;;  %v313_v36 = vld [vmem:[%s1114_s2 + $0x18] sm:$0xff]  ;;  %v302_v40 = vld [vmem:[%s1113_s1 + $0x40] sm:$0xff]  ;;  %v308_v41 = vld [vmem:[%s1113_s1 + $0x70] sm:$0xff] }
  0x31   : > { %398 = vperm.xlu0 %767, %v324_v15   ;;  %716 = vmatpush.msra.mxu2 %v289_v16  ;;  %v310_v42 = vld [vmem:[%s1114_s2] sm:$0xff]  ;;  %v297_v43 = vld [vmem:[%s1113_s1 + $0x18] sm:$0xff]  ;;  %v311_v45 = vld [vmem:[%s1114_s2 + $0x8] sm:$0xff] }
  0x32   : > { %717 = vmatpush.msra.mxu3 %v289_v16  ;;  %467 = vmatpush.msra.mxu0 %v289_v16  ;;  %v540_v44 = vld [vmem:[%s1116_s4] sm:$0xff]  ;;  %v303_v46 = vld [vmem:[%s1113_s1 + $0x48] sm:$0xff]  ;;  %v309_v47 = vld [vmem:[%s1113_s1 + $0x78] sm:$0xff] }
  0x33   : > { %388 = vperm.xlu1 %768, %v322_v17   ;;  %718 = vmatpush.msra.mxu2 %v288_v18  ;;  %v542_v48 = vld [vmem:[%s1116_s4 + $0x10] sm:$0xff]  ;;  %v298_v49 = vld [vmem:[%s1113_s1 + $0x20] sm:$0xff]  ;;  %v543_v50 = vld [vmem:[%s1116_s4 + $0x18] sm:$0xff] }
  0x34   : > { %719 = vmatpush.msra.mxu3 %v288_v18  ;;  %468 = vmatpush.msra.mxu0 %v288_v18  ;;  %v541_v51 = vld [vmem:[%s1116_s4 + $0x8] sm:$0xff]  ;;  %v304_v52 = vld [vmem:[%s1113_s1 + $0x50] sm:$0xff] }
  0x35   : > { %720 = vmatpush.msra.mxu2 %v287_v19  ;;  %378 = vperm.xlu2 %769, %v320_v27  }
  0x36   : > { %721 = vmatpush.msra.mxu3 %v287_v19  ;;  %469 = vmatpush.msra.mxu0 %v287_v19 }
  0x37   : > { %722 = vmatpush.msra.mxu2 %v286_v21 }
  0x38   : > { %723 = vmatpush.msra.mxu3 %v286_v21  ;;  %693 = vmatmul.msk.f32.vlgmr.msra.gmra.mxu2 %vm406_vm0, %v299_v22 }
  0x39   : > { %699 = vmatmul.msk.f32.vlgmr.msra.gmra.mxu3 %vm406_vm0, %v305_v23  ;;  %470 = vmatpush.msra.mxu0 %v286_v21 }
  0x3a   : > { %373 = vperm.xlu0 %767, %v319_v24   ;;  %688 = vmatmul.msk.f32.vlgmr.msra.gmra.mxu0 %vm406_vm0, %v294_v25 }
  0x3b   : > { %368 = vperm.xlu1 %768, %v318_v26  }
  0x3d   : > { %363 = vperm.xlu2 %769, %v317_v33  }
  0x40   : > { %694 = vmatmul.msk.f32.gmra.mxu2 %vm406_vm0, %v300_v28 }
  0x41   : > { %700 = vmatmul.msk.f32.gmra.mxu3 %vm406_vm0, %v306_v29 }
  0x42   : > { %358 = vperm.xlu0 %767, %v316_v30   ;;  %689 = vmatmul.msk.f32.gmra.mxu0 %vm406_vm0, %v295_v31 }
  0x43   : > { %353 = vperm.xlu1 %768, %v315_v32  }
  0x45   : > { %348 = vperm.xlu2 %769, %v314_v39  }
  0x48   : > { %695 = vmatmul.msk.f32.gmra.mxu2 %vm406_vm0, %v301_v34 }
  0x49   : > { %701 = vmatmul.msk.f32.gmra.mxu3 %vm406_vm0, %v307_v35 }
  0x4a   : > { %343 = vperm.xlu0 %767, %v313_v36   ;;  %690 = vmatmul.msk.f32.gmra.mxu0 %vm406_vm0, %v296_v37 }
  0x4b   : > { %338 = vperm.xlu1 %768, %v312_v38  }
  0x4d   : > { %333 = vperm.xlu2 %769, %v311_v45  }
  0x50   : > { %696 = vmatmul.msk.f32.gmra.mxu2 %vm406_vm0, %v302_v40 }
  0x51   : > { %702 = vmatmul.msk.f32.gmra.mxu3 %vm406_vm0, %v308_v41 }
  0x52   : > { %328 = vperm.xlu0 %767, %v310_v42   ;;  %691 = vmatmul.msk.f32.gmra.mxu0 %vm406_vm0, %v297_v43 }
  0x53   : > { %546 = vperm.xlu1 %768, %v540_v44  }
  0x55   : > { %551 = vperm.xlu2 %769, %v541_v51  }
  0x58   : > { %697 = vmatmul.msk.f32.gmra.mxu2 %vm406_vm0, %v303_v46 }
  0x59   : > { %703 = vmatmul.msk.f32.gmra.mxu3 %vm406_vm0, %v309_v47 }
  0x5a   : > { %556 = vperm.xlu0 %767, %v542_v48   ;;  %692 = vmatmul.msk.f32.gmra.mxu0 %vm406_vm0, %v298_v49 }
  0x5b   : > { %561 = vperm.xlu1 %768, %v543_v50  }
  0x60   : > { %698 = vmatmul.msk.f32.gmra.mxu2 %vm406_vm0, %v304_v52 }
  0x85   : > { %v384_v62 = vpop.permute.xlu2 %383 }
  0x8f   : > { %v379_v4 = vpop.permute.xlu2 %378 }
  0x97   : > { %v364_v16 = vpop.permute.xlu2 %363 }
  0x9a   : > { %v404_v57 = vpop.permute.xlu0 %403  ;;  %v394_v59 = vpop.permute.xlu1 %393 }
  0x9f   : > { %v349_v31 = vpop.permute.xlu2 %348 }
  0xa3   : > { %v399_v63 = vpop.permute.xlu0 %398 }
  0xa5   : > { %v389_v3 = vpop.permute.xlu1 %388 }
  0xa7   : > { %v334_v45 = vpop.permute.xlu2 %333 }
  0xac   : > { %v374_v5 = vpop.permute.xlu0 %373 }
  0xad   : > { %v369_v13 = vpop.permute.xlu1 %368 }
  0xb4   : > { %v359_v17 = vpop.permute.xlu0 %358 }
  0xb5   : > { %v354_v28 = vpop.permute.xlu1 %353 }
  0xb7   : > { %v1062_v58 = vpop.f32.mrf.mxu0 }
  0xbb   : > { %v487_v53 = vpop.f32.mrf.mxu2 }
  0xbc   : > { %v505_v54 = vpop.f32.mrf.mxu3  ;;  %v344_v34 = vpop.permute.xlu0 %343  ;;  %v488_v36 = vadd.f32 %v487_v53, %v354_v28  ;;  %v536_v53 = vld [vmem:[%s1115_s3] sm:$0xff] }
  0xbd   : > { %v506_v18 = vadd.f32 %v505_v54, %v384_v62  ;;  %v339_v42 = vpop.permute.xlu1 %338  ;;  %v537_v54 = vld [vmem:[%s1115_s3 + $0x8] sm:$0xff] }
  0xbe   : > { %v525_v40 = vmax.f32 %v488_v36, 0.0 }
  0xbf   : > { %v475_v0 = vpop.f32.mrf.mxu0  ;;  %v531_v24 = vmax.f32 %v506_v18, 0.0 }
  0xc0   : > { %v476_v46 = vadd.f32 %v475_v0, %v334_v45 }
  0xc2   : > { %v521_v51 = vmax.f32 %v476_v46, 0.0 }
  0xc3   : > { %v490_v55 = vpop.f32.mrf.mxu2 }
  0xc4   : > { %v508_v56 = vpop.f32.mrf.mxu3  ;;  %v491_v32 = vadd.f32 %v490_v55, %v359_v17  ;;  %v329_v48 = vpop.permute.xlu0 %328  ;;  %v538_v55 = vld [vmem:[%s1115_s3 + $0x10] sm:$0xff] }
  0xc5   : > { %v509_v14 = vadd.f32 %v508_v56, %v389_v3  ;;  %v473_v50 = vadd.f32 %v1062_v58, %v329_v48  ;;  %v539_v56 = vld [vmem:[%s1115_s3 + $0x18] sm:$0xff] }
  0xc6   : > { %v526_v38 = vmax.f32 %v491_v32, 0.0 }
  0xc7   : > { %v478_v6 = vpop.f32.mrf.mxu0  ;;  %v532_v22 = vmax.f32 %v509_v14, 0.0  ;;  %v520_v52 = vmax.f32 %v473_v50, 0.0 }
  0xc8   : > { %v479_v43 = vadd.f32 %v478_v6, %v339_v42 }
  0xca   : > { %v522_v49 = vmax.f32 %v479_v43, 0.0 }
  0xcb   : > { %v493_v60 = vpop.f32.mrf.mxu2 }
  0xcc   : > { %v511_v61 = vpop.f32.mrf.mxu3  ;;  %v494_v29 = vadd.f32 %v493_v60, %v364_v16  ;;  %v552_v60 = vpop.permute.xlu2 %551 }
  0xcd   : > { %v512_v11 = vadd.f32 %v511_v61, %v394_v59 }
  0xce   : > { %v527_v37 = vmax.f32 %v494_v29, 0.0 }
  0xcf   : > { %v533_v19 = vmax.f32 %v512_v11, 0.0  ;;  %v481_v20 = vpop.f32.mrf.mxu0 }
  0xd0   : > { %v482_v41 = vadd.f32 %v481_v20, %v344_v34 }
  0xd2   : > { %v523_v47 = vmax.f32 %v482_v41, 0.0 }
  0xd3   : > { %v496_v1 = vpop.f32.mrf.mxu2 }
  0xd4   : > { %v514_v2 = vpop.f32.mrf.mxu3  ;;  %v497_v26 = vadd.f32 %v496_v1, %v369_v13 }
  0xd5   : > { %v515_v9 = vadd.f32 %v514_v2, %v399_v63  ;;  %v557_v63 = vpop.permute.xlu0 %556 }
  0xd6   : > { %v528_v33 = vmax.f32 %v497_v26, 0.0 }
  0xd7   : > { %v534_v15 = vmax.f32 %v515_v9, 0.0  ;;  %v484_v35 = vpop.f32.mrf.mxu0 }
  0xd8   : > { %v485_v39 = vadd.f32 %v484_v35, %v349_v31 }
  0xda   : > { %v524_v44 = vmax.f32 %v485_v39, 0.0 }
  0xdb   : > { %v499_v7 = vpop.f32.mrf.mxu2 }
  0xdc   : > { %v517_v8 = vpop.f32.mrf.mxu3  ;;  %v500_v25 = vadd.f32 %v499_v7, %v374_v5 }
  0xdd   : > { %v518_v10 = vadd.f32 %v517_v8, %v404_v57  ;;  %v547_v57 = vpop.permute.xlu1 %546 }
  0xde   : > { %v529_v30 = vmax.f32 %v500_v25, 0.0 }
  0xdf   : > { %v535_v12 = vmax.f32 %v518_v10, 0.0 }
  0xe1   : > { %564 = vmatpush.msra.mxu1 %v535_v12 }
  0xe3   : > { %565 = vmatpush.msra.mxu1 %v534_v15  ;;  %v502_v21 = vpop.f32.mrf.mxu2 }
  0xe4   : > { %v503_v23 = vadd.f32 %v502_v21, %v379_v4 }
  0xe5   : > { %566 = vmatpush.msra.mxu1 %v533_v19  ;;  %v562_v2 = vpop.permute.xlu1 %561 }
  0xe6   : > { %v530_v27 = vmax.f32 %v503_v23, 0.0 }
  0xe7   : > { %567 = vmatpush.msra.mxu1 %v532_v22 }
  0xe9   : > { %568 = vmatpush.msra.mxu1 %v531_v24 }
  0xeb   : > { %569 = vmatpush.msra.mxu1 %v530_v27 }
  0xed   : > { %570 = vmatpush.msra.mxu1 %v529_v30 }
  0xef   : > { %571 = vmatpush.msra.mxu1 %v528_v33 }
  0xf1   : > { %572 = vmatpush.msra.mxu1 %v527_v37 }
  0xf3   : > { %573 = vmatpush.msra.mxu1 %v526_v38 }
  0xf5   : > { %574 = vmatpush.msra.mxu1 %v525_v40 }
  0xf7   : > { %575 = vmatpush.msra.mxu1 %v524_v44 }
  0xf9   : > { %576 = vmatpush.msra.mxu1 %v523_v47 }
  0xfb   : > { %577 = vmatpush.msra.mxu1 %v522_v49 }
  0xfd   : > { %578 = vmatpush.msra.mxu1 %v521_v51 }
  0xff   : > { %579 = vmatpush.msra.mxu1 %v520_v52 }
 0x100   : > { %580 = vmatmul.f32.vlgmr.msra.gmra.mxu1 %v536_v53 }
 0x108   : > { %583 = vmatmul.f32.gmra.mxu1 %v537_v54 }
 0x110   : > { %586 = vmatmul.f32.gmra.mxu1 %v538_v55 }
 0x118   : > { %589 = vmatmul.f32.gmra.mxu1 %v539_v56 }
 0x17d   : > { %v581_v58 = vpop.f32.mrf.mxu1 }
 0x17e   : > { %v582_v59 = vadd.f32 %v581_v58, %v547_v57 }
 0x180   : > { %593 = vst [vmem:[%s285_s30] sm:$0xff] %v582_v59 }
 0x185   : > { %v584_v61 = vpop.f32.mrf.mxu1 }
 0x186   : > { %v585_v62 = vadd.f32 %v584_v61, %v552_v60 }
 0x188   : > { %594 = vst [vmem:[%s285_s30 + $0x8] sm:$0xff] %v585_v62 }
 0x18d   : > { %v587_v0 = vpop.f32.mrf.mxu1 }
 0x18e   : > { %v588_v1 = vadd.f32 %v587_v0, %v557_v63 }
 0x190   : > { %595 = vst [vmem:[%s285_s30 + $0x10] sm:$0xff] %v588_v1 }
 0x195   : > { %v590_v3 = vpop.f32.mrf.mxu1 }
 0x196   : > { %v591_v4 = vadd.f32 %v590_v3, %v562_v2 }
 0x198   : > { %596 = vst [vmem:[%s285_s30 + $0x18] sm:$0xff] %v591_v4 }
 0x199   : > { %797 = shalt.err (!%p794_p5)
}
 0x19a   : > { %s835_s12 = smov 128   ;;  %s836_s26 = smov 256  }
 0x19b   : > { %s837_s30 = smov 8  }
 0x19c   : > { %724 = dma.vmem_to_hbm [thread:$0]  (%p906_p6), %s610_s10, 512, %s612_s11, %s598_s13, %s835_s12, %s836_s26, %s837_s30  }
 0x19d PF: > { %s626_s6 = sand.u32 1, %s820_s18   ;;  %p727_p7 = pnand %p682_p9, %p910_p8 }
 0x19e   : > { %s627_s7 = scalar_lea.sflag [#allocation4], %s626_s6 }
 0x19f   : > { %p728_p10 = pneg %p727_p7 }
 0x1a1   : > { %815 = dma.done.wait (%p728_p10), %s627_s7, 512  }
 0x1a2   : > { %817 = vsyncadd (%p728_p10), %s627_s7, 4294966784  ;;  %p15_p11 = scmp.ge.s32.totalorder %s891_s24, 4   ;;  %s1120_s18 = smov %s824_s19 }
 0x1a3   : > { %s1121_s19 = smov %s828_s20  ;;  %s1122_s20 = smov %s904_s27 }
 0x1a4   : > { %s1123_s21 = smov %s891_s24  ;;  %17 = sbr.rel (!%p15_p11) target bundleno = 3 (0x3), region = 118 }
 0x1a9   :  { %633 = vsyncpa [#allocation4], 1 }
 0x1aa   :  { %635 = vsyncpa [#allocation4 + $0x1], 1 }

</bundles_post_ra>
